<compile_context>
chip_gen: v7x
topology: tpu7x:2x2x1
jax: 0.10.0
libtpu: 0.0.40
codegen_flags: <defaults>
</compile_context>

<pallas_src>
import jax
import jax.numpy as jnp
from jax.experimental import pallas as pl
from jax.experimental.pallas import tpu as pltpu

PADDING_IDX = 1  # esm1_alphabet.padding_idx for ESM-1


def _round_up(x, m):
    return ((x + m - 1) // m) * m


def _avg_pool_kernel(tok_ref, hid_ref, out_ref, acc_ref, den_ref):
    # tok_ref: (TB, 1, TL) int32    this batch tile's tokens (one L tile)
    # hid_ref: (TB, TL, H)          this batch tile's hidden states (one L tile)
    # out_ref: (TB, H)              pooled embeddings (written at last L step)
    # acc_ref: (TB, H)  f32 scratch accumulator (masked sum over L)
    # den_ref: (TB, 1)  f32 scratch accumulator (mask sum over L)
    l = pl.program_id(1)

    @pl.when(l == 0)
    def _():
        acc_ref[...] = jnp.zeros_like(acc_ref)
        den_ref[...] = jnp.zeros_like(den_ref)

    mask = 1.0 - (tok_ref[:, 0, :] == PADDING_IDX).astype(jnp.float32)    # (TB, TL)
    hid = hid_ref[...].astype(jnp.float32)                                # (TB, TL, H)

    # VPU masked reduction over the sequence axis (no degenerate M=1 matmul).
    acc_ref[...] += jnp.sum(hid * mask[..., None], axis=1)                # (TB, H)
    den_ref[...] += jnp.sum(mask, axis=-1, keepdims=True)                 # (TB, 1)

    @pl.when(l == pl.num_programs(1) - 1)
    def _():
        # NOTE: an all-padding row divides by zero (inf/NaN), matching the
        # PyTorch reference exactly.  Rows added by batch padding are filled
        # with non-padding token ids, so they never hit this.
        inv = pl.reciprocal(den_ref[...], approx=False)                   # (TB, 1)
        out_ref[...] = (acc_ref[...] * inv).astype(out_ref.dtype)


def pooler_avg(tokens, outputs, *, vmem_budget_bytes=8 << 20):
    """'avg' pooling: masked mean over the sequence axis. Returns (B, H)."""
    B, L, H = outputs.shape
    assert tokens.shape == (B, L)
    itemsize = jnp.dtype(outputs.dtype).itemsize

    # ---- choose batch tile (tb) and sequence tile (tl) -------------------
    # Budget the double-buffered hidden slab (dominant VMEM consumer) against a
    # conservative 8 MiB so the kernel fits v5e's 16 MiB default scoped VMEM and
    # v7x's smaller VMEM without raising vmem_limit_bytes.
    row_bytes = 2 * L * H * itemsize
    tb = (vmem_budget_bytes // max(row_bytes, 1)) // 8 * 8
    if tb >= 8:
        # Whole (tb, L, H) slab per step.
        tl = L
        tb = min(tb, _round_up(B, 8))
        if tb >= _round_up(B, 8) and B >= 16:
            # Keep >= 2 batch-tile grid steps so v7x can shard across both TCs.
            tb = max(8, _round_up((B + 1) // 2, 8))
    else:
        # Per-row slab too large: add an L-reduction axis (accumulator pattern).
        tb = 8
        tl = (vmem_budget_bytes // (2 * tb * H * itemsize)) // 128 * 128
        tl = max(128, tl)
        tl = min(tl, _round_up(L, 128))

    B_pad = _round_up(B, tb)
    L_pad = _round_up(L, tl)

    # Pad L with padding tokens (mask == 0 -> excluded from the mean) and B with
    # a non-padding token id (non-zero denominator; padded rows are sliced off).
    non_pad_tok = 0 if PADDING_IDX != 0 else PADDING_IDX + 1
    tok = tokens.astype(jnp.int32)
    tok = jnp.pad(tok, ((0, 0), (0, L_pad - L)), constant_values=PADDING_IDX)
    tok = jnp.pad(tok, ((0, B_pad - B), (0, 0)), constant_values=non_pad_tok)
    hid = jnp.pad(outputs, ((0, B_pad - B), (0, L_pad - L), (0, 0)))
    tok3 = tok.reshape(B_pad, 1, L_pad)

    grid = (B_pad // tb, L_pad // tl)
    out = pl.pallas_call(
        _avg_pool_kernel,
        out_shape=jax.ShapeDtypeStruct((B_pad, H), outputs.dtype),
        grid=grid,
        in_specs=[
            pl.BlockSpec((tb, 1, tl), lambda b, l: (b, 0, l)),
            pl.BlockSpec((tb, tl, H), lambda b, l: (b, l, 0)),
        ],
        out_specs=pl.BlockSpec((tb, H), lambda b, l: (b, 0)),
        scratch_shapes=[
            pltpu.VMEM((tb, H), jnp.float32),   # masked-sum accumulator
            pltpu.VMEM((tb, 1), jnp.float32),   # mask-count accumulator
        ],
        compiler_params=pltpu.CompilerParams(
            dimension_semantics=("parallel", "arbitrary")),
        cost_estimate=pl.CostEstimate(
            flops=2 * B_pad * L_pad * H,
            transcendentals=0,
            bytes_accessed=(B_pad * L_pad * H * itemsize     # hidden read
                            + B_pad * L_pad * 4              # tokens read
                            + B_pad * H * itemsize)),        # output write
    )(tok3, hid)
    return out[:B]


def pooler_forward(pooler_type, tokens, outputs):
    """Parameter-free Pooler.forward(tokens, outputs)."""
    assert pooler_type in ("cls", "avg"), "unrecognized pooling type %s" % pooler_type
    if pooler_type == "cls":
        # last_hidden[:, 0, 0] is pure indexing (no compute) -> plain JAX glue.
        return outputs[:, 0, 0]
    return pooler_avg(tokens, outputs)


def _reference_avg(tokens, outputs):
    mask = 1.0 - (tokens == PADDING_IDX).astype(jnp.float32)             # (B, L)
    num = (outputs.astype(jnp.float32) * mask[..., None]).sum(axis=1)    # (B, H)
    den = mask.sum(axis=-1)[:, None]                                     # (B, 1)
    return num / den


if __name__ == "__main__":
    key = jax.random.PRNGKey(0)
    k_tok, k_hid, k_tok2, k_hid2 = jax.random.split(key, 4)

    # ---- test 1: small shape, single-tile path (tl == L) -----------------
    B, L, H = 2, 8, 32
    tokens = jax.random.randint(k_tok, (B, L), 2, 10, dtype=jnp.int32)
    tokens = tokens.at[1, L - 3:].set(PADDING_IDX)          # trailing padding
    outputs = jax.random.normal(k_hid, (B, L, H), dtype=jnp.float32)

    pooled_avg = pooler_forward("avg", tokens, outputs)
    jax.block_until_ready(pooled_avg)
    pooled_cls = pooler_forward("cls", tokens, outputs)
    jax.block_until_ready(pooled_cls)

    ref_avg = _reference_avg(tokens, outputs)
    assert pooled_avg.shape == (B, H)
    assert pooled_cls.shape == (B,)
    assert jnp.allclose(pooled_avg, ref_avg, atol=1e-5, rtol=1e-5)
    assert jnp.allclose(pooled_cls, outputs[:, 0, 0])

    # ---- test 2: forces the L-reduction accumulator path + L padding -----
    B2, L2, H2 = 4, 200, 128
    tokens2 = jax.random.randint(k_tok2, (B2, L2), 2, 10, dtype=jnp.int32)
    tokens2 = tokens2.at[0, L2 - 17:].set(PADDING_IDX)
    tokens2 = tokens2.at[3, L2 - 5:].set(PADDING_IDX)
    outputs2 = jax.random.normal(k_hid2, (B2, L2, H2), dtype=jnp.float32)

    pooled_avg2 = pooler_avg(tokens2, outputs2, vmem_budget_bytes=1 << 20)
    jax.block_until_ready(pooled_avg2)
    ref_avg2 = _reference_avg(tokens2, outputs2)
    assert pooled_avg2.shape == (B2, H2)
    assert jnp.allclose(pooled_avg2, ref_avg2, atol=1e-4, rtol=1e-4)

    # ---- test 3: bf16 hidden states (kernel accumulates in f32) ----------
    outputs_bf16 = outputs.astype(jnp.bfloat16)
    pooled_bf16 = pooler_forward("avg", tokens, outputs_bf16)
    jax.block_until_ready(pooled_bf16)
    ref_bf16 = _reference_avg(tokens, outputs_bf16.astype(jnp.float32))
    assert jnp.allclose(pooled_bf16.astype(jnp.float32), ref_bf16,
                        atol=2e-2, rtol=2e-2)

    print("KERNEL_OK")
</pallas_src>

<mosaic_0001>
module attributes {stable_mosaic.version = 11 : i64} {
  func.func @_avg_pool_kernel(%arg0: i32, %arg1: i32, %arg2: memref<8x1x8xi32, #tpu.memory_space<vmem>>, %arg3: memref<8x8x32xf32, #tpu.memory_space<vmem>>, %arg4: memref<8x32xf32, #tpu.memory_space<vmem>>, %arg5: memref<8x32xf32, #tpu.memory_space<vmem>>, %arg6: memref<8x1xf32, #tpu.memory_space<vmem>>) attributes {dimension_semantics = [#tpu.dimension_semantics<parallel>, #tpu.dimension_semantics<arbitrary>], iteration_bounds = array<i64: 1, 1>, scalar_prefetch = 0 : i64, scratch_operands = 2 : i64, tpu.core_type = #tpu.core_type<tc>, window_params = [{transform_indices = @transform_0, window_bounds = array<i64: 8, 1, 8>}, {transform_indices = @transform_1, window_bounds = array<i64: 8, 8, 32>}, {transform_indices = @transform_2, window_bounds = array<i64: 8, 32>}]} {
    %c0_i32 = arith.constant 0 : i32
    %0 = arith.cmpi eq, %arg1, %c0_i32 : i32
    %1 = arith.extui %0 : i1 to i32
    %c0_i32_0 = arith.constant 0 : i32
    %2 = arith.cmpi ne, %1, %c0_i32_0 : i32
    scf.if %2 {
      %cst_18 = arith.constant 0.000000e+00 : f32
      %27 = vector.broadcast %cst_18 : f32 to vector<8x32xf32>
      %c0_19 = arith.constant 0 : index
      %c0_20 = arith.constant 0 : index
      %28 = vector.load %arg5[%c0_19, %c0_20] : memref<8x32xf32, #tpu.memory_space<vmem>>, vector<8x32xf32>
      tpu.vector_store %arg5[%c0_19, %c0_20], %27 {strides = array<i32>} : memref<8x32xf32, #tpu.memory_space<vmem>>, vector<8x32xf32>,
      %cst_21 = arith.constant 0.000000e+00 : f32
      %29 = vector.broadcast %cst_21 : f32 to vector<8x1xf32>
      %c0_22 = arith.constant 0 : index
      %c0_23 = arith.constant 0 : index
      %30 = vector.load %arg6[%c0_22, %c0_23] : memref<8x1xf32, #tpu.memory_space<vmem>>, vector<8x1xf32>
      tpu.vector_store %arg6[%c0_22, %c0_23], %29 {strides = array<i32>} : memref<8x1xf32, #tpu.memory_space<vmem>>, vector<8x1xf32>,
    } else {
    }
    %c0 = arith.constant 0 : index
    %c0_1 = arith.constant 0 : index
    %c0_2 = arith.constant 0 : index
    %3 = vector.load %arg2[%c0, %c0_1, %c0_2] : memref<8x1x8xi32, #tpu.memory_space<vmem>>, vector<8x1x8xi32>
    %4 = vector.shape_cast %3 : vector<8x1x8xi32> to vector<8x8xi32>
    %c1_i32 = arith.constant 1 : i32
    %5 = vector.broadcast %c1_i32 : i32 to vector<8x8xi32>
    %6 = arith.cmpi eq, %4, %5 : vector<8x8xi32>
    %7 = arith.extui %6 : vector<8x8xi1> to vector<8x8xi32>
    %8 = arith.sitofp %7 : vector<8x8xi32> to vector<8x8xf32>
    %cst = arith.constant 1.000000e+00 : f32
    %9 = vector.broadcast %cst : f32 to vector<8x8xf32>
    %10 = arith.subf %9, %8 : vector<8x8xf32>
    %c0_3 = arith.constant 0 : index
    %c0_4 = arith.constant 0 : index
    %c0_5 = arith.constant 0 : index
    %11 = vector.load %arg3[%c0_3, %c0_4, %c0_5] : memref<8x8x32xf32, #tpu.memory_space<vmem>>, vector<8x8x32xf32>
    %c0_6 = arith.constant 0 : index
    %c0_7 = arith.constant 0 : index
    %12 = vector.load %arg5[%c0_6, %c0_7] : memref<8x32xf32, #tpu.memory_space<vmem>>, vector<8x32xf32>
    %13 = vector.shape_cast %10 : vector<8x8xf32> to vector<8x8x1xf32>
    %14 = vector.broadcast %13 : vector<8x8x1xf32> to vector<8x8x32xf32>
    %15 = arith.mulf %11, %14 : vector<8x8x32xf32>
    %cst_8 = arith.constant dense<0.000000e+00> : vector<8x32xf32>
    %16 = vector.multi_reduction <add>, %15, %cst_8 [1] : vector<8x8x32xf32> to vector<8x32xf32>
    %17 = arith.addf %12, %16 : vector<8x32xf32>
    %c0_9 = arith.constant 0 : index
    %c0_10 = arith.constant 0 : index
    %18 = vector.load %arg5[%c0_9, %c0_10] : memref<8x32xf32, #tpu.memory_space<vmem>>, vector<8x32xf32>
    tpu.vector_store %arg5[%c0_9, %c0_10], %17 {strides = array<i32>} : memref<8x32xf32, #tpu.memory_space<vmem>>, vector<8x32xf32>,
    %c0_11 = arith.constant 0 : index
    %c0_12 = arith.constant 0 : index
    %19 = vector.load %arg6[%c0_11, %c0_12] : memref<8x1xf32, #tpu.memory_space<vmem>>, vector<8x1xf32>
    %cst_13 = arith.constant dense<0.000000e+00> : vector<8xf32>
    %20 = vector.multi_reduction <add>, %10, %cst_13 [1] : vector<8x8xf32> to vector<8xf32>
    %21 = vector.shape_cast %20 : vector<8xf32> to vector<8x1xf32>
    %22 = arith.addf %19, %21 : vector<8x1xf32>
    %c0_14 = arith.constant 0 : index
    %c0_15 = arith.constant 0 : index
    %23 = vector.load %arg6[%c0_14, %c0_15] : memref<8x1xf32, #tpu.memory_space<vmem>>, vector<8x1xf32>
    tpu.vector_store %arg6[%c0_14, %c0_15], %22 {strides = array<i32>} : memref<8x1xf32, #tpu.memory_space<vmem>>, vector<8x1xf32>,
    %c0_i32_16 = arith.constant 0 : i32
    %24 = arith.cmpi eq, %arg1, %c0_i32_16 : i32
    %25 = arith.extui %24 : i1 to i32
    %c0_i32_17 = arith.constant 0 : i32
    %26 = arith.cmpi ne, %25, %c0_i32_17 : i32
    scf.if %26 {
      %c0_18 = arith.constant 0 : index
      %c0_19 = arith.constant 0 : index
      %27 = vector.load %arg6[%c0_18, %c0_19] : memref<8x1xf32, #tpu.memory_space<vmem>>, vector<8x1xf32>
      %28 = tpu.reciprocal %27 : vector<8x1xf32> -> vector<8x1xf32>
      %c0_20 = arith.constant 0 : index
      %c0_21 = arith.constant 0 : index
      %29 = vector.load %arg5[%c0_20, %c0_21] : memref<8x32xf32, #tpu.memory_space<vmem>>, vector<8x32xf32>
      %30 = vector.broadcast %28 : vector<8x1xf32> to vector<8x32xf32>
      %31 = arith.mulf %29, %30 : vector<8x32xf32>
      %c0_22 = arith.constant 0 : index
      %c0_23 = arith.constant 0 : index
      %32 = vector.load %arg4[%c0_22, %c0_23] : memref<8x32xf32, #tpu.memory_space<vmem>>, vector<8x32xf32>
      tpu.vector_store %arg4[%c0_22, %c0_23], %31 {strides = array<i32>} : memref<8x32xf32, #tpu.memory_space<vmem>>, vector<8x32xf32>,
    } else {
    }
    return
  }
  func.func @transform_0(%arg0: i32, %arg1: i32) -> (i32, i32, i32) {
    %c0_i32 = arith.constant 0 : i32
    %c0_i32_0 = arith.constant 0 : i32
    return %arg0, %c0_i32, %arg1 : i32, i32, i32
  }
  func.func @transform_1(%arg0: i32, %arg1: i32) -> (i32, i32, i32) {
    %c0_i32 = arith.constant 0 : i32
    %c0_i32_0 = arith.constant 0 : i32
    return %arg0, %arg1, %c0_i32 : i32, i32, i32
  }
  func.func @transform_2(%arg0: i32, %arg1: i32) -> (i32, i32) {
    %c0_i32 = arith.constant 0 : i32
    %c0_i32_0 = arith.constant 0 : i32
    return %arg0, %c0_i32 : i32, i32
  }
}

</mosaic_0001>

<bundles_post_ra>
// kernel: tpu_custom_call.1
= control target key start
LH: loop header
LB: loop body
LE: loop exit
PB: predicated region body
PF: predicated region fallthrough
CT: control target
= control target key end

     0   :  { %7 = vsyncpa [#allocation5], 0  ;;  %s525_s0 = inlined_call_operand.hbm [shape: s32[8,1,8], index: 0, kind: input, shape index: {}]   ;;  %s526_s1 = inlined_call_operand.hbm [shape: f32[8,8,32], index: 1, kind: input, shape index: {}]   ;;  %s527_s2 = inlined_call_operand.hbm [shape: f32[8,32], index: 2, kind: output, shape index: {}]  }
   0x1   :  { %8 = vsyncpa [#allocation8], 0 }
   0x2   :  { %9 = vsyncpa [#allocation6], 0  ;;  %s431_s9 = smov [#allocation4]   ;;  %s359_s13 = scalar_lea.hbm %s525_s0, 128 }
   0x3   :  { %s15_s10 = sshll.u32 %s431_s9, 4  ;;  %p360_p0 = scmp.ne.s32.totalorder %s525_s0, %s359_s13  ;;  %s16_s10 = int_to_ptr.vmem [resolvable:$true] %s15_s10 }
   0x4   :  { %p363_p1 = scmp.lt.u32.totalorder %s359_s13, %s525_s0 }
   0x6   :  { %p365_p2 = pnand %p363_p1, %p360_p0 }
   0x8   :  { %368 = shalt.err (!%p365_p2)
}
   0x9   :  { %s369_s18 = scalar_lea.vmem %s16_s10, 128  ;;  %p374_p4 = scmp.lt.s32.totalorder %s16_s10, %s16_s10 }
   0xa   :  { %p370_p3 = scmp.ne.s32.totalorder %s16_s10, %s369_s18  ;;  %p375_p5 = scmp.lt.s32.totalorder %s369_s18, %s369_s18 }
   0xc   :  { %p376_p6 = por %p375_p5, %p374_p4 }
   0xe   :  { %p377_p7 = pnand %p376_p6, %p370_p3 }
  0x10   :  { %380 = shalt.err (!%p377_p7)
}
  0x11   :  { %s432_s19 = smov 16   ;;  %s433_s20 = smov 1  }
  0x12   :  { %21 = dma.hbm_to_vmem [thread:$0]  %s525_s0, 128, %s16_s10, [#allocation5], %s432_s19, %s432_s19, %s433_s20  }
  0x13   :  { %s434_s23 = smov [#allocation7]   ;;  %s381_s27 = scalar_lea.hbm %s526_s1, 1024 }
  0x14   :  { %s27_s24 = sshll.u32 %s434_s23, 4  ;;  %p382_p8 = scmp.ne.s32.totalorder %s526_s1, %s381_s27  ;;  %s28_s24 = int_to_ptr.vmem [resolvable:$true] %s27_s24 }
  0x15   :  { %p385_p9 = scmp.lt.u32.totalorder %s381_s27, %s526_s1 }
  0x17   :  { %p387_p10 = pnand %p385_p9, %p382_p8 }
  0x19   :  { %390 = shalt.err (!%p387_p10)
}
  0x1a   :  { %s391_s4 = scalar_lea.vmem %s28_s24, 1024  ;;  %p396_p12 = scmp.lt.s32.totalorder %s28_s24, %s28_s24 }
  0x1b   :  { %p392_p11 = scmp.ne.s32.totalorder %s28_s24, %s391_s4  ;;  %p397_p13 = scmp.lt.s32.totalorder %s391_s4, %s391_s4 }
  0x1d   :  { %p398_p0 = por %p397_p13, %p396_p12 }
  0x1f   :  { %p399_p1 = pnand %p398_p0, %p392_p11 }
  0x21   :  { %402 = shalt.err (!%p399_p1)
}
  0x22   :  { %s435_s0 = smov 128   ;;  %s436_s5 = smov 8  }
  0x23   :  { %33 = dma.hbm_to_vmem [thread:$0]  %s526_s1, 1024, %s28_s24, [#allocation8], %s435_s0, %s435_s0, %s436_s5  }
  0x24   :  { %425 = dma.done.wait [#allocation5], 128  }
  0x25   :  { %426 = vsyncadd [#allocation5], 4294967168 }
  0x26   :  { %427 = dma.done.wait [#allocation8], 1024  }
  0x27   :  { %428 = vsyncadd [#allocation8], 4294966272  ;;  %v97_v0 = vlaneseq  ;;  %v437_v1 = vmov 1966171168   ;;  %vm46_vm0 = vcmask 7168   ;;  %v438_v3 = vmov 0.0  }
  0x28   :  { %v257_v2 = vunpack.c.l.s4 %v437_v1  ;;  %47 = vst.msk [vmem:[#allocation3] sm:$0xff] %vm46_vm0, %v438_v3  ;;  %v48_v7 = vld [vmem:[#allocation4] sm:$0x1]  ;;  %v49_v8 = vld [vmem:[#allocation4 + $0x1] sm:$0x1]  ;;  %vm302_vm9 = vcmask 64512  }
  0x29   :  { %v98_v4 = vshrl.u32 %v97_v0, 7  ;;  %v50_v9 = vld [vmem:[#allocation4 + $0x2] sm:$0x1]  ;;  %v51_v10 = vld [vmem:[#allocation4 + $0x3] sm:$0x1]  ;;  %vm56_vm1 = vcmp.eq.s32.totalorder %v48_v7, 1 }
  0x2a   :  { %v258_v5 = vunpack.c.0.s8 %v257_v2  ;;  %v52_v11 = vld [vmem:[#allocation4 + $0x4] sm:$0x1]  ;;  %v53_v12 = vld [vmem:[#allocation4 + $0x5] sm:$0x1]  ;;  %v54_v13 = vld [vmem:[#allocation4 + $0x6] sm:$0x1] }
  0x2b   :  { %v482_v6 = vsub.s32 0, %v98_v4  ;;  %v55_v14 = vld [vmem:[#allocation4 + $0x7] sm:$0x1]  ;;  %vm57_vm2 = vcmp.eq.s32.totalorder %v49_v8, 1  ;;  %vm58_vm3 = vcmp.eq.s32.totalorder %v50_v9, 1  ;;  %vm59_vm4 = vcmp.eq.s32.totalorder %v51_v10, 1 }
  0x2c   :  { %v261_v15 = vsub.s32 %v258_v5, %v98_v4  ;;  %vm60_vm5 = vcmp.eq.s32.totalorder %v52_v11, 1  ;;  %vm61_vm6 = vcmp.eq.s32.totalorder %v53_v12, 1  ;;  %vm62_vm7 = vcmp.eq.s32.totalorder %v54_v13, 1  ;;  %v89_v60 = vld [vmem:[#allocation7 + $0x8] sm:$0xff]  ;;  %v90_v62 = vld [vmem:[#allocation7 + $0x10] sm:$0xff]  ;;  %v91_v63 = vld [vmem:[#allocation7 + $0x18] sm:$0xff] }
  0x2d   :  { %vm63_vm8 = vcmp.eq.s32.totalorder %v55_v14, 1  ;;  %v338_v16 = vsel %vm56_vm1, 1.0, %v438_v3  ;;  %v339_v17 = vsel %vm57_vm2, 1.0, %v438_v3  ;;  %v340_v18 = vsel %vm58_vm3, 1.0, %v438_v3  ;;  %v92_v1 = vld [vmem:[#allocation7 + $0x20] sm:$0xff]  ;;  %v93_v4 = vld [vmem:[#allocation7 + $0x28] sm:$0xff] }
  0x2e   :  { %v341_v19 = vsel %vm59_vm4, 1.0, %v438_v3  ;;  %v342_v20 = vsel %vm60_vm5, 1.0, %v438_v3  ;;  %v343_v21 = vsel %vm61_vm6, 1.0, %v438_v3  ;;  %v344_v22 = vsel %vm62_vm7, 1.0, %v438_v3  ;;  %v95_v8 = vld [vmem:[#allocation7 + $0x38] sm:$0xff]  ;;  %s440_s1 = smov [#allocation9]  }
  0x2f   :  { %v345_v23 = vsel %vm63_vm8, 1.0, %v438_v3  ;;  %v80_v24 = vsub.f32 1.0, %v338_v16  ;;  %v81_v25 = vsub.f32 1.0, %v339_v17  ;;  %v82_v26 = vsub.f32 1.0, %v340_v18  ;;  %s328_s8 = sshll.u32 %s440_s1, 4  ;;  %s329_s8 = int_to_ptr.vmem [resolvable:$true] %s328_s8 }
  0x30   :  { %v83_v27 = vsub.f32 1.0, %v341_v19  ;;  %v84_v28 = vsub.f32 1.0, %v342_v20  ;;  %v85_v29 = vsub.f32 1.0, %v343_v21  ;;  %v86_v30 = vsub.f32 1.0, %v344_v22  ;;  %v243_v19 = vld [vmem:[#allocation3] sm:$0xff]  ;;  %s403_s9 = scalar_lea.vmem %s329_s8, 128  ;;  %p408_p3 = scmp.lt.s32.totalorder %s329_s8, %s329_s8 }
  0x31   :  { %v87_v31 = vsub.f32 1.0, %v345_v23  ;;  %v252_v32 = vcombine.low %v80_v24, %v81_v25  ;;  %v107_v33 = vrot.slane %v81_v25, %v482_v6  ;;  %v114_v38 = vrot.slane %v82_v26, %v482_v6  ;;  %p404_p2 = scmp.ne.s32.totalorder %s329_s8, %s403_s9  ;;  %p409_p4 = scmp.lt.s32.totalorder %s403_s9, %s403_s9 }
  0x32   :  { %v253_v34 = vcombine.low %v82_v26, %v83_v27  ;;  %v254_v35 = vcombine.low %v84_v28, %v85_v29  ;;  %v121_v44 = vrot.slane %v83_v27, %v482_v6  ;;  %v128_v48 = vrot.slane %v84_v28, %v482_v6 }
  0x33   :  { %v255_v36 = vcombine.low %v86_v30, %v87_v31  ;;  %v262_v37 = vrot.slane %v252_v32, %v261_v15  ;;  %109 = vbcast.lane.b32.xlu1 %v107_v33, 256  ;;  %v135_v50 = vrot.slane %v85_v29, %v482_v6  ;;  %v142_v51 = vrot.slane %v86_v30, %v482_v6  ;;  %p410_p5 = por %p409_p4, %p408_p3 }
  0x34   :  { %v269_v39 = vrot.slane %v253_v34, %v261_v15  ;;  %v276_v40 = vrot.slane %v254_v35, %v261_v15  ;;  %v149_v52 = vrot.slane %v87_v31, %v482_v6  ;;  %v439_v53 = vmov 0   ;;  %v88_v31 = vld [vmem:[#allocation7] sm:$0xff] }
  0x35   :  { %v283_v41 = vrot.slane %v255_v36, %v261_v15  ;;  %356 = vset.pattern.permute.xlu0 %v439_v53  ;;  %v100_v54 = vrot.slane %v80_v24, %v482_v6  ;;  %vm44_vm10 = vcmask 261120   ;;  %v94_v6 = vld [vmem:[#allocation7 + $0x30] sm:$0xff]  ;;  %vm226_vm11 = vcmask 1041409   ;;  %p411_p6 = pnand %p410_p5, %p404_p2 }
  0x36   :  { %v284_v42 = vcombine.low %v262_v37, %v269_v39  ;;  %45 = vst.msk [vmem:[#allocation2] sm:$0xff] %vm44_vm10, %v438_v3  ;;  %vm228_vm12 = vcmask 1042434   ;;  %vm230_vm13 = vcmask 1043459   ;;  %vm232_vm14 = vcmask 1044484  }
  0x37   :  { %v285_v43 = vcombine.low %v276_v40, %v283_v41  ;;  %116 = vbcast.lane.b32.xlu1 %v114_v38, 256  ;;  %vm234_vm15 = vcmask 1045509   ;;  %vm238_vm1 = vcmask 1047559  }
  0x38   :  { %v292_v45 = vrot.slane %v284_v42, %v261_v15 }
  0x39   :  { %v299_v46 = vrot.slane %v285_v43, %v261_v15 }
  0x3b   :  { %v300_v47 = vcombine.low %v292_v45, %v299_v46  ;;  %123 = vbcast.lane.b32.xlu1 %v121_v44, 256 }
  0x3d   :  { %v303_v49 = vsel %vm302_vm9, %v300_v47, 0.0 }
  0x3e   :  { %304 = vadd.xlane.f32.xlu0 %v303_v49 }
  0x3f   :  { %130 = vbcast.lane.b32.xlu1 %v128_v48, 256 }
  0x43   :  { %137 = vbcast.lane.b32.xlu1 %v135_v50, 256 }
  0x47   :  { %144 = vbcast.lane.b32.xlu1 %v142_v51, 256 }
  0x4b   :  { %151 = vbcast.lane.b32.xlu1 %v149_v52, 256 }
  0x54   :  { %102 = vbcast.lane.b32.xlu0 %v100_v54, 256 }
  0xa5   :  { %v110_v55 = vpop.permute.xlu1 %109 }
  0xa6   :  { %v154_v0 = vmul.f32 %v110_v55, %v89_v60 }
  0xa8   :  { %v169_v3 = vsel %vm44_vm10, %v154_v0, 0.0 }
  0xa9   :  { %v117_v56 = vpop.permute.xlu1 %116  ;;  %v170_v15 = vrot.slane %v169_v3, 4 }
  0xaa   :  { %v155_v2 = vmul.f32 %v117_v56, %v90_v62 }
  0xab   :  { %v171_v25 = vadd.f32 %v170_v15, %v169_v3 }
  0xac   :  { %v176_v11 = vsel %vm44_vm10, %v155_v2, 0.0 }
  0xad   :  { %v124_v57 = vpop.permute.xlu1 %123  ;;  %v177_v17 = vrot.slane %v176_v11, 4  ;;  %v172_v34 = vrot.slane %v171_v25, 2 }
  0xae   :  { %v156_v5 = vmul.f32 %v124_v57, %v91_v63 }
  0xaf   :  { %v178_v28 = vadd.f32 %v177_v17, %v176_v11  ;;  %v173_v44 = vadd.f32 %v172_v34, %v171_v25  ;;  %v96_v17 = vld [vmem:[#allocation2] sm:$0xff] }
  0xb0   :  { %v183_v13 = vsel %vm44_vm10, %v156_v5, 0.0 }
  0xb1   :  { %v131_v58 = vpop.permute.xlu1 %130  ;;  %v184_v20 = vrot.slane %v183_v13, 4  ;;  %v179_v37 = vrot.slane %v178_v28, 2  ;;  %v174_v54 = vrot.slane %v173_v44, 1 }
  0xb2   :  { %v157_v7 = vmul.f32 %v131_v58, %v92_v1 }
  0xb3   :  { %v185_v30 = vadd.f32 %v184_v20, %v183_v13  ;;  %v180_v47 = vadd.f32 %v179_v37, %v178_v28  ;;  %v175_v63 = vadd.f32 %v174_v54, %v173_v44 }
  0xb4   :  { %v190_v16 = vsel %vm44_vm10, %v157_v7, 0.0 }
  0xb5   :  { %v138_v59 = vpop.permute.xlu1 %137  ;;  %v191_v22 = vrot.slane %v190_v16, 4  ;;  %v186_v40 = vrot.slane %v185_v30, 2  ;;  %v181_v57 = vrot.slane %v180_v47, 1 }
  0xb6   :  { %v158_v10 = vmul.f32 %v138_v59, %v93_v4 }
  0xb7   :  { %v192_v33 = vadd.f32 %v191_v22, %v190_v16  ;;  %v187_v50 = vadd.f32 %v186_v40, %v185_v30  ;;  %v182_v2 = vadd.f32 %v181_v57, %v180_v47 }
  0xb8   :  { %v197_v18 = vsel %vm44_vm10, %v158_v10, 0.0 }
  0xb9   :  { %v145_v61 = vpop.permute.xlu1 %144  ;;  %v198_v26 = vrot.slane %v197_v18, 4  ;;  %v193_v42 = vrot.slane %v192_v33, 2  ;;  %v188_v59 = vrot.slane %v187_v50, 1 }
  0xba   :  { %v159_v12 = vmul.f32 %v145_v61, %v94_v6 }
  0xbb   :  { %v199_v35 = vadd.f32 %v198_v26, %v197_v18  ;;  %v194_v53 = vadd.f32 %v193_v42, %v192_v33  ;;  %v189_v5 = vadd.f32 %v188_v59, %v187_v50 }
  0xbc   :  { %v204_v21 = vsel %vm44_vm10, %v159_v12, 0.0 }
  0xbd   :  { %v152_v9 = vpop.permute.xlu1 %151  ;;  %v205_v29 = vrot.slane %v204_v21, 4  ;;  %v200_v45 = vrot.slane %v199_v35, 2  ;;  %v195_v62 = vrot.slane %v194_v53, 1 }
  0xbe   :  { %v160_v14 = vmul.f32 %v152_v9, %v95_v8 }
  0xbf   :  { %v206_v39 = vadd.f32 %v205_v29, %v204_v21  ;;  %v201_v55 = vadd.f32 %v200_v45, %v199_v35  ;;  %v196_v8 = vadd.f32 %v195_v62, %v194_v53 }
  0xc0   :  { %v211_v23 = vsel %vm44_vm10, %v160_v14, 0.0 }
  0xc1   :  { %v212_v32 = vrot.slane %v211_v23, 4  ;;  %v207_v48 = vrot.slane %v206_v39, 2  ;;  %v202_v0 = vrot.slane %v201_v55, 1 }
  0xc3   :  { %v213_v41 = vadd.f32 %v212_v32, %v211_v23  ;;  %v208_v58 = vadd.f32 %v207_v48, %v206_v39  ;;  %v203_v9 = vadd.f32 %v202_v0, %v201_v55 }
  0xc5   :  { %v214_v52 = vrot.slane %v213_v41, 2  ;;  %v209_v4 = vrot.slane %v208_v58, 1 }
  0xc7   :  { %v215_v61 = vadd.f32 %v214_v52, %v213_v41  ;;  %v210_v12 = vadd.f32 %v209_v4, %v208_v58 }
  0xc9   :  { %v216_v7 = vrot.slane %v215_v61, 1 }
  0xcb   :  { %v305_v24 = vpop.xlane.xlu0 %304  ;;  %v217_v14 = vadd.f32 %v216_v7, %v215_v61 }
  0xcc   :  { %v306_v27 = vadd.f32 %v305_v24, %v243_v19 }
  0xce   :  { %308 = vst.msk [vmem:[#allocation3] sm:$0xff] %vm46_vm0, %v306_v27  ;;  %vm236_vm0 = vcmask 1046534  }
  0xcf   :  { %v103_v36 = vpop.permute.xlu0 %102 }
  0xd0   :  { %v153_v38 = vmul.f32 %v103_v36, %v88_v31 }
  0xd2   :  { %v162_v43 = vsel %vm44_vm10, %v153_v38, 0.0 }
  0xd3   :  { %v163_v46 = vrot.slane %v162_v43, 4 }
  0xd5   :  { %v312_v49 = vld [vmem:[#allocation3] sm:$0xff]  ;;  %v164_v51 = vadd.f32 %v163_v46, %v162_v43 }
  0xd6   :  { %357 = vrcp.f32 %v312_v49 }
  0xd7   :  { %v165_v56 = vrot.slane %v164_v51, 2 }
  0xd9   :  { %v166_v60 = vadd.f32 %v165_v56, %v164_v51 }
  0xdb   :  { %v167_v1 = vrot.slane %v166_v60, 1 }
  0xdd   :  { %v168_v6 = vadd.f32 %v167_v1, %v166_v60 }
  0xdf   :  { %v227_v3 = vsel %vm226_vm11, %v175_v63, %v168_v6 }
  0xe0   :  { %v358_v10 = vpop.eup %357  ;;  %v229_v11 = vsel %vm228_vm12, %v182_v2, %v227_v3 }
  0xe1   :  { %317 = vperm.xlu0 %356, %v358_v10   ;;  %v231_v13 = vsel %vm230_vm13, %v189_v5, %v229_v11 }
  0xe2   :  { %v233_v15 = vsel %vm232_vm14, %v196_v8, %v231_v13 }
  0xe3   :  { %v235_v16 = vsel %vm234_vm15, %v203_v9, %v233_v15 }
  0xe4   :  { %v237_v18 = vsel %vm236_vm0, %v210_v12, %v235_v16 }
  0xe5   :  { %v239_v19 = vsel %vm238_vm1, %v217_v14, %v237_v18 }
  0xe6   :  { %v241_v20 = vadd.f32 %v239_v19, %v96_v17 }
  0xe8   :  { %242 = vst.msk [vmem:[#allocation2] sm:$0xff] %vm44_vm10, %v241_v20 }
  0xef   :  { %v314_v22 = vld [vmem:[#allocation2] sm:$0xff] }
 0x160   :  { %v318_v21 = vpop.permute.xlu0 %317 }
 0x161   :  { %v320_v23 = vmul.f32 %v318_v21, %v314_v22 }
 0x163   :  { %321 = vst.msk [vmem:[#allocation9] sm:$0xff] %vm44_vm10, %v320_v23 }
 0x164   :  { %414 = shalt.err (!%p411_p6)
}
 0x165   :  { %s415_s12 = scalar_lea.hbm %s527_s2, 128 }
 0x166   :  { %p416_p7 = scmp.ne.s32.totalorder %s527_s2, %s415_s12  ;;  %p419_p8 = scmp.lt.u32.totalorder %s415_s12, %s527_s2 }
 0x168   :  { %p421_p9 = pnand %p419_p8, %p416_p7 }
 0x16a   :  { %424 = shalt.err (!%p421_p9)
}
 0x16b   :  { %331 = dma.vmem_to_hbm [thread:$0]  %s329_s8, 128, %s527_s2, [#allocation6]  }
 0x16c   :  { %429 = dma.done.wait [#allocation6], 128  }
 0x16d   :  { %430 = vsyncadd [#allocation6], 4294967168 }
 0x16e   :  { %335 = vsyncpa [#allocation5], 1 }
 0x16f   :  { %336 = vsyncpa [#allocation8], 1 }
 0x170   :  { %337 = vsyncpa [#allocation6], 1 }

</bundles_post_ra>
